<compile_context>
chip_gen: v5e
topology: v5e:2x2
jax: 0.10.0
libtpu: 0.0.40
codegen_flags: <defaults>
</compile_context>

<pallas_src>
import jax
import jax.numpy as jnp
import numpy as np
from jax import lax
from jax.experimental import pallas as pl
from jax.experimental.pallas import tpu as pltpu

EPS = 1e-5


# ----------------------------- in-kernel helpers ------------------------------

def _tap_masks(K, pad_l, L):
    """(1, L) lane-validity masks per conv tap (None == all valid).

    The conv input is stored halo-padded to Lp = L + K - 1 columns; tap k reads padded
    columns [k, k+L).  Padded column k+j is a real position iff pad_l <= k+j < pad_l+L.
    Masks are needed because BN+ReLU of a zero pad column is not zero.
    """
    pos = lax.broadcasted_iota(jnp.int32, (1, L), 1)
    masks = []
    for k in range(K):
        lo = pad_l - k
        hi = L + pad_l - k
        if lo <= 0 and hi >= L:
            masks.append(None)
        else:
            masks.append((pos >= lo) & (pos < hi))
    return masks


# --------------------------------- kernels ------------------------------------

def _make_bn1_conv1_kernel(K, pad_l, L, TB):
    pad_r = (K - 1) - pad_l

    def kernel(x_ref, a1_ref, s1_ref, w1_ref, c1_ref, ssum_ref, ssq_ref):
        # x_ref: (TB, C_in, Lp) bf16, a1/s1: (C_in, 1) f32, w1_ref: (K, C_out, C_in) bf16
        # c1_ref: (TB, C_out, Lp) bf16, ssum/ssq: (1, C_out, 1) f32
        C_out = w1_ref.shape[1]
        masks = _tap_masks(K, pad_l, L)                    # hoisted out of the loops
        a1 = a1_ref[...]
        s1 = s1_ref[...]
        ssum = jnp.zeros((C_out, 1), jnp.float32)
        ssq = jnp.zeros((C_out, 1), jnp.float32)
        zero_b = jnp.zeros((), jnp.bfloat16)
        for b in range(TB):                                # static unroll, TB is small
            acc = jnp.zeros((C_out, L), jnp.float32)
            for k in range(K):
                # BN1 + ReLU recomputed per tap (pointwise, VPU has slack; avoids a scratch)
                xw = x_ref[b, :, k:k + L].astype(jnp.float32)          # (C_in, L)
                h = jnp.maximum(xw * a1 + s1, 0.0).astype(jnp.bfloat16)
                if masks[k] is not None:
                    h = jnp.where(masks[k], h, zero_b)                 # conv zero padding
                acc = acc + jnp.dot(w1_ref[k], h,                      # (C_out, L) f32 acc
                                    preferred_element_type=jnp.float32)
            # store conv1 output into the halo-padded slot (pads written as zeros)
            c1_ref[b, :, pad_l:pad_l + L] = acc.astype(jnp.bfloat16)
            if pad_l > 0:
                c1_ref[b, :, :pad_l] = jnp.zeros((C_out, pad_l), jnp.bfloat16)
            if pad_r > 0:
                c1_ref[b, :, pad_l + L:] = jnp.zeros((C_out, pad_r), jnp.bfloat16)
            # partial BN2 statistics of the f32 conv1 output
            ssum = ssum + jnp.sum(acc, axis=1, keepdims=True)
            ssq = ssq + jnp.sum(acc * acc, axis=1, keepdims=True)
        ssum_ref[0] = ssum
        ssq_ref[0] = ssq

    return kernel


def _make_bn2_conv2_kernel(K, pad_l, L, TB):
    def kernel(c1_ref, x_ref, a2_ref, s2_ref, w2_ref, wp_ref, o_ref):
        # c1_ref: (TB, C_out, Lp) bf16, x_ref: (TB, C_in, Lp) bf16
        # a2/s2: (C_out, 1) f32, w2_ref: (K, C_out, C_out) bf16, wp_ref: (C_out, C_in) bf16
        # o_ref: (TB, C_out, L)
        C_out = w2_ref.shape[1]
        masks = _tap_masks(K, pad_l, L)
        a2 = a2_ref[...]
        s2 = s2_ref[...]
        zero_b = jnp.zeros((), jnp.bfloat16)
        for b in range(TB):
            acc = jnp.zeros((C_out, L), jnp.float32)
            for k in range(K):
                cw = c1_ref[b, :, k:k + L].astype(jnp.float32)         # (C_out, L)
                h = jnp.maximum(cw * a2 + s2, 0.0).astype(jnp.bfloat16)
                if masks[k] is not None:
                    h = jnp.where(masks[k], h, zero_b)
                acc = acc + jnp.dot(w2_ref[k], h,
                                    preferred_element_type=jnp.float32)
            # 1x1 projection residual on the raw (unpadded-columns) input
            xb = x_ref[b, :, pad_l:pad_l + L]                          # (C_in, L) bf16
            acc = acc + jnp.dot(wp_ref[...], xb, preferred_element_type=jnp.float32)
            o_ref[b] = acc.astype(o_ref.dtype)

    return kernel


# --------------------------------- wrapper -------------------------------------

def _pick_tb(N, per_elem_bytes, target_bytes=2 * 1024 * 1024):
    """Largest divisor of N whose per-step slab stays under target; keep grid >= 2 when possible."""
    best = 1
    for tb in range(1, N + 1):
        if N % tb:
            continue
        if tb * per_elem_bytes > target_bytes:
            break
        if N // tb >= 2:
            best = tb
    return best


@jax.jit
def preact_resnet_block(x_ncl, params):
    """x_ncl: (N, C_in, L) as PyTorch Conv1d input. Returns (N, C_out, L)."""
    N, C_in, L = x_ncl.shape
    C_out, _, K = params["w1"].shape
    pad_l = (K - 1) // 2
    pad_r = K - 1 - pad_l
    Lp = L + K - 1
    f32, bf16 = jnp.float32, jnp.bfloat16
    count = N * L

    # ---- BN1 batch statistics folded into the wrapper (one fused XLA pass over f32 x;
    #      shifted two-pass variance avoids E[x^2]-E[x]^2 cancellation for BN1) ----
    x32 = x_ncl.astype(f32)
    mean1 = jnp.mean(x32, axis=(0, 2))
    var1 = jnp.mean(jnp.square(x32 - mean1[None, :, None]), axis=(0, 2))
    a1 = params["g1"].astype(f32) * lax.rsqrt(var1 + EPS)
    s1 = params["b1"].astype(f32) - mean1 * a1
    a1 = a1.reshape(C_in, 1)
    s1 = s1.reshape(C_in, 1)

    # ---- activations stream in bf16, halo-padded along L only (no channel pad in HBM) ----
    x_pad = jnp.pad(x_ncl, ((0, 0), (0, 0), (pad_l, pad_r))).astype(bf16)   # (N, C_in, Lp)

    # ---- weights: tap-major bf16 MXU operands ----
    W1 = jnp.transpose(params["w1"], (2, 0, 1)).astype(bf16)   # (K, C_out, C_in)
    W2 = jnp.transpose(params["w2"], (2, 0, 1)).astype(bf16)   # (K, C_out, C_out)
    Wp = params["wp"][:, :, 0].astype(bf16)                    # (C_out, C_in)

    # ---- batch tiling: big enough slab for DMA efficiency, grid >= 2 for v7x's 2 TCs ----
    per_elem = 2 * (C_in * Lp + 2 * C_out * Lp) + 4 * C_out * L
    TB = _pick_tb(N, per_elem)
    G = N // TB

    # ---- generation-aware VMEM budget (v7x: 64 MiB physical; v5e/v6e: 128 MiB) ----
    try:
        phys = int(pltpu.get_tpu_info().vmem_capacity_bytes)
        vmem_limit = max(32 * 1024 * 1024, min(phys * 3 // 4, 100 * 1024 * 1024))
    except Exception:
        vmem_limit = 48 * 1024 * 1024
    cparams = pltpu.CompilerParams(
        dimension_semantics=("parallel",),      # batch axis shards across TCs on v7x
        vmem_limit_bytes=vmem_limit,
    )

    x_spec = pl.BlockSpec((TB, C_in, Lp), lambda g: (g, 0, 0))
    c1_spec = pl.BlockSpec((TB, C_out, Lp), lambda g: (g, 0, 0))
    y_spec = pl.BlockSpec((TB, C_out, L), lambda g: (g, 0, 0))
    st_spec = pl.BlockSpec((1, C_out, 1), lambda g: (g, 0, 0))

    def const_spec(shape):
        # constant index_map -> block stays resident in VMEM across grid steps
        return pl.BlockSpec(shape, lambda g: tuple(0 for _ in shape))

    # -------- pass 1: BN1 -> ReLU -> Conv1 (+ partial BN2 statistics) --------
    c1_pad, st_sum, st_sq = pl.pallas_call(
        _make_bn1_conv1_kernel(K, pad_l, L, TB),
        grid=(G,),
        in_specs=[x_spec,
                  const_spec((C_in, 1)), const_spec((C_in, 1)),
                  const_spec((K, C_out, C_in))],
        out_specs=(c1_spec, st_spec, st_spec),
        out_shape=(jax.ShapeDtypeStruct((N, C_out, Lp), bf16),
                   jax.ShapeDtypeStruct((G, C_out, 1), f32),
                   jax.ShapeDtypeStruct((G, C_out, 1), f32)),
        compiler_params=cparams,
    )(x_pad, a1, s1, W1)

    # fold per-step partial sums into BN2 scale/shift (tiny, wrapper-side)
    s_sum = jnp.sum(st_sum, axis=0)[:, 0]
    s_sq = jnp.sum(st_sq, axis=0)[:, 0]
    mean2 = s_sum / count
    # TODO(synk): E[x^2]-E[x]^2 in f32 can lose precision for strongly non-zero-mean conv
    # outputs; a shifted accumulation would need an extra pass over c1.
    var2 = jnp.maximum(s_sq / count - mean2 * mean2, 0.0)
    a2 = params["g2"].astype(f32) * lax.rsqrt(var2 + EPS)
    s2 = params["b2"].astype(f32) - mean2 * a2
    a2 = a2.reshape(C_out, 1)
    s2 = s2.reshape(C_out, 1)

    # -------- pass 2: BN2 -> ReLU -> Conv2 + 1x1 projection (output in native NCL) --------
    y = pl.pallas_call(
        _make_bn2_conv2_kernel(K, pad_l, L, TB),
        grid=(G,),
        in_specs=[c1_spec, x_spec,
                  const_spec((C_out, 1)), const_spec((C_out, 1)),
                  const_spec((K, C_out, C_out)),
                  const_spec((C_out, C_in))],
        out_specs=y_spec,
        out_shape=jax.ShapeDtypeStruct((N, C_out, L), x_ncl.dtype),
        compiler_params=cparams,
    )(c1_pad, x_pad, a2, s2, W2, Wp)

    return y


# ------------------------------ pure-JAX reference -----------------------------

def reference(x, params, K):
    def bn(h, g, b):
        mean = jnp.mean(h, axis=(0, 2), keepdims=True)
        var = jnp.mean((h - mean) ** 2, axis=(0, 2), keepdims=True)
        return (h - mean) * lax.rsqrt(var + EPS) * g[None, :, None] + b[None, :, None]

    def conv(h, w, pad):
        return lax.conv_general_dilated(h, w, (1,), [pad],
                                        dimension_numbers=("NCH", "OIH", "NCH"))

    pad_l = (K - 1) // 2
    pad_r = K - 1 - pad_l
    h = jax.nn.relu(bn(x, params["g1"], params["b1"]))
    h = conv(h, params["w1"], (pad_l, pad_r))
    h = jax.nn.relu(bn(h, params["g2"], params["b2"]))
    h = conv(h, params["w2"], (pad_l, pad_r))
    return h + conv(x, params["wp"], (0, 0))


# ------------------------------------ main --------------------------------------

if __name__ == "__main__":
    N, C_in, C_out, L, K = 2, 4, 8, 16, 3

    key = jax.random.PRNGKey(0)
    k1, k2, k3, kx = jax.random.split(key, 4)
    params = dict(
        w1=jax.random.normal(k1, (C_out, C_in, K), jnp.float32) * 0.1,
        w2=jax.random.normal(k2, (C_out, C_out, K), jnp.float32) * 0.1,
        wp=jax.random.normal(k3, (C_out, C_in, 1), jnp.float32) * 0.1,
        g1=jnp.ones((C_in,), jnp.float32), b1=jnp.zeros((C_in,), jnp.float32),
        g2=jnp.ones((C_out,), jnp.float32), b2=jnp.zeros((C_out,), jnp.float32),
    )
    x = jax.random.normal(kx, (N, C_in, L), jnp.float32)

    out = jax.block_until_ready(preact_resnet_block(x, params))
    ref = reference(x, params, K)

    assert out.shape == (N, C_out, L)
    # bf16 activation streams + bf16 MXU operands => relaxed tolerance vs f32 reference
    np.testing.assert_allclose(np.asarray(out), np.asarray(ref), rtol=2e-2, atol=2e-2)
    print("KERNEL_OK")
</pallas_src>

<mosaic_0001>
module attributes {stable_mosaic.version = 11 : i64} {
  func.func @kernel(%arg0: i32, %arg1: memref<1x4x18xbf16, #tpu.memory_space<vmem>>, %arg2: memref<4x1xf32, #tpu.memory_space<vmem>>, %arg3: memref<4x1xf32, #tpu.memory_space<vmem>>, %arg4: memref<3x8x4xbf16, #tpu.memory_space<vmem>>, %arg5: memref<1x8x18xbf16, #tpu.memory_space<vmem>>, %arg6: memref<1x8x1xf32, #tpu.memory_space<vmem>>, %arg7: memref<1x8x1xf32, #tpu.memory_space<vmem>>) attributes {dimension_semantics = [#tpu.dimension_semantics<parallel>], iteration_bounds = array<i64: 2>, scalar_prefetch = 0 : i64, scratch_operands = 0 : i64, tpu.core_type = #tpu.core_type<tc>, window_params = [{transform_indices = @transform_0, window_bounds = array<i64: 1, 4, 18>}, {pipeline_mode = #tpu.pipeline_mode<synchronous>, transform_indices = @transform_1, window_bounds = array<i64: 4, 1>}, {pipeline_mode = #tpu.pipeline_mode<synchronous>, transform_indices = @transform_2, window_bounds = array<i64: 4, 1>}, {pipeline_mode = #tpu.pipeline_mode<synchronous>, transform_indices = @transform_3, window_bounds = array<i64: 3, 8, 4>}, {transform_indices = @transform_4, window_bounds = array<i64: 1, 8, 18>}, {transform_indices = @transform_5, window_bounds = array<i64: 1, 8, 1>}, {transform_indices = @transform_6, window_bounds = array<i64: 1, 8, 1>}]} {
    %0 = tpu.iota {dimensions = array<i32: 1>} : vector<1x16xi32>
    %c1_i32 = arith.constant 1 : i32
    %1 = vector.broadcast %c1_i32 : i32 to vector<1x16xi32>
    %2 = arith.cmpi sge, %0, %1 : vector<1x16xi32>
    %c17_i32 = arith.constant 17 : i32
    %3 = vector.broadcast %c17_i32 : i32 to vector<1x16xi32>
    %4 = arith.cmpi slt, %0, %3 : vector<1x16xi32>
    %5 = arith.andi %2, %4 : vector<1x16xi1>
    %c-1_i32 = arith.constant -1 : i32
    %6 = vector.broadcast %c-1_i32 : i32 to vector<1x16xi32>
    %7 = arith.cmpi sge, %0, %6 : vector<1x16xi32>
    %c15_i32 = arith.constant 15 : i32
    %8 = vector.broadcast %c15_i32 : i32 to vector<1x16xi32>
    %9 = arith.cmpi slt, %0, %8 : vector<1x16xi32>
    %10 = arith.andi %7, %9 : vector<1x16xi1>
    %c0 = arith.constant 0 : index
    %c0_0 = arith.constant 0 : index
    %11 = vector.load %arg2[%c0, %c0_0] : memref<4x1xf32, #tpu.memory_space<vmem>>, vector<4x1xf32>
    %c0_1 = arith.constant 0 : index
    %c0_2 = arith.constant 0 : index
    %12 = vector.load %arg3[%c0_1, %c0_2] : memref<4x1xf32, #tpu.memory_space<vmem>>, vector<4x1xf32>
    %cst = arith.constant 0.000000e+00 : f32
    %13 = vector.broadcast %cst : f32 to vector<8x1xf32>
    %cst_3 = arith.constant 0.000000e+00 : f32
    %14 = vector.broadcast %cst_3 : f32 to vector<8x1xf32>
    %cst_4 = arith.constant 0.000000e+00 : f32
    %15 = vector.broadcast %cst_4 : f32 to vector<8x16xf32>
    %c0_5 = arith.constant 0 : index
    %c0_6 = arith.constant 0 : index
    %c0_7 = arith.constant 0 : index
    %16 = vector.load %arg1[%c0_5, %c0_6, %c0_7] : memref<1x4x18xbf16, #tpu.memory_space<vmem>>, vector<1x4x16xbf16>
    %17 = vector.shape_cast %16 : vector<1x4x16xbf16> to vector<4x16xbf16>
    %18 = arith.extf %17 : vector<4x16xbf16> to vector<4x16xf32>
    %19 = vector.broadcast %11 : vector<4x1xf32> to vector<4x16xf32>
    %20 = arith.mulf %18, %19 : vector<4x16xf32>
    %21 = vector.broadcast %12 : vector<4x1xf32> to vector<4x16xf32>
    %22 = arith.addf %20, %21 : vector<4x16xf32>
    %cst_8 = arith.constant 0.000000e+00 : f32
    %23 = vector.broadcast %cst_8 : f32 to vector<4x16xf32>
    %24 = arith.maximumf %22, %23 : vector<4x16xf32>
    %25 = arith.truncf %24 : vector<4x16xf32> to vector<4x16xbf16>
    %cst_9 = arith.constant 0.000000e+00 : bf16
    %26 = vector.shape_cast %5 : vector<1x16xi1> to vector<1x16xi1>
    %27 = vector.broadcast %26 : vector<1x16xi1> to vector<4x16xi1>
    %28 = vector.broadcast %cst_9 : bf16 to vector<4x16xbf16>
    %29 = arith.select %27, %25, %28 : vector<4x16xi1>, vector<4x16xbf16>
    %c0_10 = arith.constant 0 : index
    %c0_11 = arith.constant 0 : index
    %c0_12 = arith.constant 0 : index
    %30 = vector.load %arg4[%c0_10, %c0_11, %c0_12] : memref<3x8x4xbf16, #tpu.memory_space<vmem>>, vector<1x8x4xbf16>
    %31 = vector.shape_cast %30 : vector<1x8x4xbf16> to vector<8x4xbf16>
    %cst_13 = arith.constant dense<0.000000e+00> : vector<8x16xf32>
    %32 = tpu.matmul %31, %29, %cst_13 {dimension_numbers = #tpu.dot_dimension_numbers<[1], [0], [0], [1], [0, 0, 1, 1], [], []>} : vector<8x4xbf16>, vector<4x16xbf16>, vector<8x16xf32> -> vector<8x16xf32>
    %33 = arith.addf %15, %32 : vector<8x16xf32>
    %c0_14 = arith.constant 0 : index
    %c0_15 = arith.constant 0 : index
    %c1 = arith.constant 1 : index
    %34 = vector.load %arg1[%c0_14, %c0_15, %c1] : memref<1x4x18xbf16, #tpu.memory_space<vmem>>, vector<1x4x16xbf16>
    %35 = vector.shape_cast %34 : vector<1x4x16xbf16> to vector<4x16xbf16>
    %36 = arith.extf %35 : vector<4x16xbf16> to vector<4x16xf32>
    %37 = vector.broadcast %11 : vector<4x1xf32> to vector<4x16xf32>
    %38 = arith.mulf %36, %37 : vector<4x16xf32>
    %39 = vector.broadcast %12 : vector<4x1xf32> to vector<4x16xf32>
    %40 = arith.addf %38, %39 : vector<4x16xf32>
    %cst_16 = arith.constant 0.000000e+00 : f32
    %41 = vector.broadcast %cst_16 : f32 to vector<4x16xf32>
    %42 = arith.maximumf %40, %41 : vector<4x16xf32>
    %43 = arith.truncf %42 : vector<4x16xf32> to vector<4x16xbf16>
    %c1_17 = arith.constant 1 : index
    %c0_18 = arith.constant 0 : index
    %c0_19 = arith.constant 0 : index
    %44 = vector.load %arg4[%c1_17, %c0_18, %c0_19] : memref<3x8x4xbf16, #tpu.memory_space<vmem>>, vector<1x8x4xbf16>
    %45 = vector.shape_cast %44 : vector<1x8x4xbf16> to vector<8x4xbf16>
    %cst_20 = arith.constant dense<0.000000e+00> : vector<8x16xf32>
    %46 = tpu.matmul %45, %43, %cst_20 {dimension_numbers = #tpu.dot_dimension_numbers<[1], [0], [0], [1], [0, 0, 1, 1], [], []>} : vector<8x4xbf16>, vector<4x16xbf16>, vector<8x16xf32> -> vector<8x16xf32>
    %47 = arith.addf %33, %46 : vector<8x16xf32>
    %c0_21 = arith.constant 0 : index
    %c0_22 = arith.constant 0 : index
    %c2 = arith.constant 2 : index
    %48 = vector.load %arg1[%c0_21, %c0_22, %c2] : memref<1x4x18xbf16, #tpu.memory_space<vmem>>, vector<1x4x16xbf16>
    %49 = vector.shape_cast %48 : vector<1x4x16xbf16> to vector<4x16xbf16>
    %50 = arith.extf %49 : vector<4x16xbf16> to vector<4x16xf32>
    %51 = vector.broadcast %11 : vector<4x1xf32> to vector<4x16xf32>
    %52 = arith.mulf %50, %51 : vector<4x16xf32>
    %53 = vector.broadcast %12 : vector<4x1xf32> to vector<4x16xf32>
    %54 = arith.addf %52, %53 : vector<4x16xf32>
    %cst_23 = arith.constant 0.000000e+00 : f32
    %55 = vector.broadcast %cst_23 : f32 to vector<4x16xf32>
    %56 = arith.maximumf %54, %55 : vector<4x16xf32>
    %57 = arith.truncf %56 : vector<4x16xf32> to vector<4x16xbf16>
    %cst_24 = arith.constant 0.000000e+00 : bf16
    %58 = vector.shape_cast %10 : vector<1x16xi1> to vector<1x16xi1>
    %59 = vector.broadcast %58 : vector<1x16xi1> to vector<4x16xi1>
    %60 = vector.broadcast %cst_24 : bf16 to vector<4x16xbf16>
    %61 = arith.select %59, %57, %60 : vector<4x16xi1>, vector<4x16xbf16>
    %c2_25 = arith.constant 2 : index
    %c0_26 = arith.constant 0 : index
    %c0_27 = arith.constant 0 : index
    %62 = vector.load %arg4[%c2_25, %c0_26, %c0_27] : memref<3x8x4xbf16, #tpu.memory_space<vmem>>, vector<1x8x4xbf16>
    %63 = vector.shape_cast %62 : vector<1x8x4xbf16> to vector<8x4xbf16>
    %cst_28 = arith.constant dense<0.000000e+00> : vector<8x16xf32>
    %64 = tpu.matmul %63, %61, %cst_28 {dimension_numbers = #tpu.dot_dimension_numbers<[1], [0], [0], [1], [0, 0, 1, 1], [], []>} : vector<8x4xbf16>, vector<4x16xbf16>, vector<8x16xf32> -> vector<8x16xf32>
    %65 = arith.addf %47, %64 : vector<8x16xf32>
    %66 = arith.truncf %65 : vector<8x16xf32> to vector<8x16xbf16>
    %c0_29 = arith.constant 0 : index
    %c0_30 = arith.constant 0 : index
    %c1_31 = arith.constant 1 : index
    %67 = vector.load %arg5[%c0_29, %c0_30, %c1_31] : memref<1x8x18xbf16, #tpu.memory_space<vmem>>, vector<1x8x16xbf16>
    %68 = vector.shape_cast %67 : vector<1x8x16xbf16> to vector<8x16xbf16>
    %69 = vector.shape_cast %66 : vector<8x16xbf16> to vector<1x8x16xbf16>
    tpu.vector_store %arg5[%c0_29, %c0_30, %c1_31], %69 {strides = array<i32>} : memref<1x8x18xbf16, #tpu.memory_space<vmem>>, vector<1x8x16xbf16>,
    %cst_32 = arith.constant 0.000000e+00 : bf16
    %70 = vector.broadcast %cst_32 : bf16 to vector<8x1xbf16>
    %c0_33 = arith.constant 0 : index
    %c0_34 = arith.constant 0 : index
    %c0_35 = arith.constant 0 : index
    %71 = vector.load %arg5[%c0_33, %c0_34, %c0_35] : memref<1x8x18xbf16, #tpu.memory_space<vmem>>, vector<1x8x1xbf16>
    %72 = vector.shape_cast %71 : vector<1x8x1xbf16> to vector<8x1xbf16>
    %73 = vector.shape_cast %70 : vector<8x1xbf16> to vector<1x8x1xbf16>
    tpu.vector_store %arg5[%c0_33, %c0_34, %c0_35], %73 {strides = array<i32>} : memref<1x8x18xbf16, #tpu.memory_space<vmem>>, vector<1x8x1xbf16>,
    %cst_36 = arith.constant 0.000000e+00 : bf16
    %74 = vector.broadcast %cst_36 : bf16 to vector<8x1xbf16>
    %c0_37 = arith.constant 0 : index
    %c0_38 = arith.constant 0 : index
    %c17 = arith.constant 17 : index
    %75 = vector.load %arg5[%c0_37, %c0_38, %c17] : memref<1x8x18xbf16, #tpu.memory_space<vmem>>, vector<1x8x1xbf16>
    %76 = vector.shape_cast %75 : vector<1x8x1xbf16> to vector<8x1xbf16>
    %77 = vector.shape_cast %74 : vector<8x1xbf16> to vector<1x8x1xbf16>
    tpu.vector_store %arg5[%c0_37, %c0_38, %c17], %77 {strides = array<i32>} : memref<1x8x18xbf16, #tpu.memory_space<vmem>>, vector<1x8x1xbf16>,
    %cst_39 = arith.constant dense<0.000000e+00> : vector<8xf32>
    %78 = vector.multi_reduction <add>, %65, %cst_39 [1] : vector<8x16xf32> to vector<8xf32>
    %79 = vector.shape_cast %78 : vector<8xf32> to vector<8x1xf32>
    %80 = arith.addf %13, %79 : vector<8x1xf32>
    %81 = arith.mulf %65, %65 : vector<8x16xf32>
    %cst_40 = arith.constant dense<0.000000e+00> : vector<8xf32>
    %82 = vector.multi_reduction <add>, %81, %cst_40 [1] : vector<8x16xf32> to vector<8xf32>
    %83 = vector.shape_cast %82 : vector<8xf32> to vector<8x1xf32>
    %84 = arith.addf %14, %83 : vector<8x1xf32>
    %c0_41 = arith.constant 0 : index
    %c0_42 = arith.constant 0 : index
    %c0_43 = arith.constant 0 : index
    %85 = vector.load %arg6[%c0_41, %c0_42, %c0_43] : memref<1x8x1xf32, #tpu.memory_space<vmem>>, vector<1x8x1xf32>
    %86 = vector.shape_cast %85 : vector<1x8x1xf32> to vector<8x1xf32>
    %87 = vector.shape_cast %80 : vector<8x1xf32> to vector<1x8x1xf32>
    tpu.vector_store %arg6[%c0_41, %c0_42, %c0_43], %87 {strides = array<i32>} : memref<1x8x1xf32, #tpu.memory_space<vmem>>, vector<1x8x1xf32>,
    %c0_44 = arith.constant 0 : index
    %c0_45 = arith.constant 0 : index
    %c0_46 = arith.constant 0 : index
    %88 = vector.load %arg7[%c0_44, %c0_45, %c0_46] : memref<1x8x1xf32, #tpu.memory_space<vmem>>, vector<1x8x1xf32>
    %89 = vector.shape_cast %88 : vector<1x8x1xf32> to vector<8x1xf32>
    %90 = vector.shape_cast %84 : vector<8x1xf32> to vector<1x8x1xf32>
    tpu.vector_store %arg7[%c0_44, %c0_45, %c0_46], %90 {strides = array<i32>} : memref<1x8x1xf32, #tpu.memory_space<vmem>>, vector<1x8x1xf32>,
    return
  }
  func.func @transform_0(%arg0: i32) -> (i32, i32, i32) {
    %c0_i32 = arith.constant 0 : i32
    %c0_i32_0 = arith.constant 0 : i32
    %c0_i32_1 = arith.constant 0 : i32
    return %arg0, %c0_i32, %c0_i32_0 : i32, i32, i32
  }
  func.func @transform_1(%arg0: i32) -> (i32, i32) {
    %c0_i32 = arith.constant 0 : i32
    %c0_i32_0 = arith.constant 0 : i32
    %c0_i32_1 = arith.constant 0 : i32
    return %c0_i32, %c0_i32_0 : i32, i32
  }
  func.func @transform_2(%arg0: i32) -> (i32, i32) {
    %c0_i32 = arith.constant 0 : i32
    %c0_i32_0 = arith.constant 0 : i32
    %c0_i32_1 = arith.constant 0 : i32
    return %c0_i32, %c0_i32_0 : i32, i32
  }
  func.func @transform_3(%arg0: i32) -> (i32, i32, i32) {
    %c0_i32 = arith.constant 0 : i32
    %c0_i32_0 = arith.constant 0 : i32
    %c0_i32_1 = arith.constant 0 : i32
    %c0_i32_2 = arith.constant 0 : i32
    return %c0_i32, %c0_i32_0, %c0_i32_1 : i32, i32, i32
  }
  func.func @transform_4(%arg0: i32) -> (i32, i32, i32) {
    %c0_i32 = arith.constant 0 : i32
    %c0_i32_0 = arith.constant 0 : i32
    %c0_i32_1 = arith.constant 0 : i32
    return %arg0, %c0_i32, %c0_i32_0 : i32, i32, i32
  }
  func.func @transform_5(%arg0: i32) -> (i32, i32, i32) {
    %c0_i32 = arith.constant 0 : i32
    %c0_i32_0 = arith.constant 0 : i32
    %c0_i32_1 = arith.constant 0 : i32
    return %arg0, %c0_i32, %c0_i32_0 : i32, i32, i32
  }
  func.func @transform_6(%arg0: i32) -> (i32, i32, i32) {
    %c0_i32 = arith.constant 0 : i32
    %c0_i32_0 = arith.constant 0 : i32
    %c0_i32_1 = arith.constant 0 : i32
    return %arg0, %c0_i32, %c0_i32_0 : i32, i32, i32
  }
}

module attributes {stable_mosaic.version = 11 : i64} {
  func.func @kernel(%arg0: i32, %arg1: memref<1x8x18xbf16, #tpu.memory_space<vmem>>, %arg2: memref<1x4x18xbf16, #tpu.memory_space<vmem>>, %arg3: memref<8x1xf32, #tpu.memory_space<vmem>>, %arg4: memref<8x1xf32, #tpu.memory_space<vmem>>, %arg5: memref<3x8x8xbf16, #tpu.memory_space<vmem>>, %arg6: memref<8x4xbf16, #tpu.memory_space<vmem>>, %arg7: memref<1x8x16xf32, #tpu.memory_space<vmem>>) attributes {dimension_semantics = [#tpu.dimension_semantics<parallel>], iteration_bounds = array<i64: 2>, scalar_prefetch = 0 : i64, scratch_operands = 0 : i64, tpu.core_type = #tpu.core_type<tc>, window_params = [{transform_indices = @transform_0, window_bounds = array<i64: 1, 8, 18>}, {transform_indices = @transform_1, window_bounds = array<i64: 1, 4, 18>}, {pipeline_mode = #tpu.pipeline_mode<synchronous>, transform_indices = @transform_2, window_bounds = array<i64: 8, 1>}, {pipeline_mode = #tpu.pipeline_mode<synchronous>, transform_indices = @transform_3, window_bounds = array<i64: 8, 1>}, {pipeline_mode = #tpu.pipeline_mode<synchronous>, transform_indices = @transform_4, window_bounds = array<i64: 3, 8, 8>}, {pipeline_mode = #tpu.pipeline_mode<synchronous>, transform_indices = @transform_5, window_bounds = array<i64: 8, 4>}, {transform_indices = @transform_6, window_bounds = array<i64: 1, 8, 16>}]} {
    %0 = tpu.iota {dimensions = array<i32: 1>} : vector<1x16xi32>
    %c1_i32 = arith.constant 1 : i32
    %1 = vector.broadcast %c1_i32 : i32 to vector<1x16xi32>
    %2 = arith.cmpi sge, %0, %1 : vector<1x16xi32>
    %c17_i32 = arith.constant 17 : i32
    %3 = vector.broadcast %c17_i32 : i32 to vector<1x16xi32>
    %4 = arith.cmpi slt, %0, %3 : vector<1x16xi32>
    %5 = arith.andi %2, %4 : vector<1x16xi1>
    %c-1_i32 = arith.constant -1 : i32
    %6 = vector.broadcast %c-1_i32 : i32 to vector<1x16xi32>
    %7 = arith.cmpi sge, %0, %6 : vector<1x16xi32>
    %c15_i32 = arith.constant 15 : i32
    %8 = vector.broadcast %c15_i32 : i32 to vector<1x16xi32>
    %9 = arith.cmpi slt, %0, %8 : vector<1x16xi32>
    %10 = arith.andi %7, %9 : vector<1x16xi1>
    %c0 = arith.constant 0 : index
    %c0_0 = arith.constant 0 : index
    %11 = vector.load %arg3[%c0, %c0_0] : memref<8x1xf32, #tpu.memory_space<vmem>>, vector<8x1xf32>
    %c0_1 = arith.constant 0 : index
    %c0_2 = arith.constant 0 : index
    %12 = vector.load %arg4[%c0_1, %c0_2] : memref<8x1xf32, #tpu.memory_space<vmem>>, vector<8x1xf32>
    %cst = arith.constant 0.000000e+00 : f32
    %13 = vector.broadcast %cst : f32 to vector<8x16xf32>
    %c0_3 = arith.constant 0 : index
    %c0_4 = arith.constant 0 : index
    %c0_5 = arith.constant 0 : index
    %14 = vector.load %arg1[%c0_3, %c0_4, %c0_5] : memref<1x8x18xbf16, #tpu.memory_space<vmem>>, vector<1x8x16xbf16>
    %15 = vector.shape_cast %14 : vector<1x8x16xbf16> to vector<8x16xbf16>
    %16 = arith.extf %15 : vector<8x16xbf16> to vector<8x16xf32>
    %17 = vector.broadcast %11 : vector<8x1xf32> to vector<8x16xf32>
    %18 = arith.mulf %16, %17 : vector<8x16xf32>
    %19 = vector.broadcast %12 : vector<8x1xf32> to vector<8x16xf32>
    %20 = arith.addf %18, %19 : vector<8x16xf32>
    %cst_6 = arith.constant 0.000000e+00 : f32
    %21 = vector.broadcast %cst_6 : f32 to vector<8x16xf32>
    %22 = arith.maximumf %20, %21 : vector<8x16xf32>
    %23 = arith.truncf %22 : vector<8x16xf32> to vector<8x16xbf16>
    %cst_7 = arith.constant 0.000000e+00 : bf16
    %24 = vector.shape_cast %5 : vector<1x16xi1> to vector<1x16xi1>
    %25 = vector.broadcast %24 : vector<1x16xi1> to vector<8x16xi1>
    %26 = vector.broadcast %cst_7 : bf16 to vector<8x16xbf16>
    %27 = arith.select %25, %23, %26 : vector<8x16xi1>, vector<8x16xbf16>
    %c0_8 = arith.constant 0 : index
    %c0_9 = arith.constant 0 : index
    %c0_10 = arith.constant 0 : index
    %28 = vector.load %arg5[%c0_8, %c0_9, %c0_10] : memref<3x8x8xbf16, #tpu.memory_space<vmem>>, vector<1x8x8xbf16>
    %29 = vector.shape_cast %28 : vector<1x8x8xbf16> to vector<8x8xbf16>
    %cst_11 = arith.constant dense<0.000000e+00> : vector<8x16xf32>
    %30 = tpu.matmul %29, %27, %cst_11 {dimension_numbers = #tpu.dot_dimension_numbers<[1], [0], [0], [1], [0, 0, 1, 1], [], []>} : vector<8x8xbf16>, vector<8x16xbf16>, vector<8x16xf32> -> vector<8x16xf32>
    %31 = arith.addf %13, %30 : vector<8x16xf32>
    %c0_12 = arith.constant 0 : index
    %c0_13 = arith.constant 0 : index
    %c1 = arith.constant 1 : index
    %32 = vector.load %arg1[%c0_12, %c0_13, %c1] : memref<1x8x18xbf16, #tpu.memory_space<vmem>>, vector<1x8x16xbf16>
    %33 = vector.shape_cast %32 : vector<1x8x16xbf16> to vector<8x16xbf16>
    %34 = arith.extf %33 : vector<8x16xbf16> to vector<8x16xf32>
    %35 = vector.broadcast %11 : vector<8x1xf32> to vector<8x16xf32>
    %36 = arith.mulf %34, %35 : vector<8x16xf32>
    %37 = vector.broadcast %12 : vector<8x1xf32> to vector<8x16xf32>
    %38 = arith.addf %36, %37 : vector<8x16xf32>
    %cst_14 = arith.constant 0.000000e+00 : f32
    %39 = vector.broadcast %cst_14 : f32 to vector<8x16xf32>
    %40 = arith.maximumf %38, %39 : vector<8x16xf32>
    %41 = arith.truncf %40 : vector<8x16xf32> to vector<8x16xbf16>
    %c1_15 = arith.constant 1 : index
    %c0_16 = arith.constant 0 : index
    %c0_17 = arith.constant 0 : index
    %42 = vector.load %arg5[%c1_15, %c0_16, %c0_17] : memref<3x8x8xbf16, #tpu.memory_space<vmem>>, vector<1x8x8xbf16>
    %43 = vector.shape_cast %42 : vector<1x8x8xbf16> to vector<8x8xbf16>
    %cst_18 = arith.constant dense<0.000000e+00> : vector<8x16xf32>
    %44 = tpu.matmul %43, %41, %cst_18 {dimension_numbers = #tpu.dot_dimension_numbers<[1], [0], [0], [1], [0, 0, 1, 1], [], []>} : vector<8x8xbf16>, vector<8x16xbf16>, vector<8x16xf32> -> vector<8x16xf32>
    %45 = arith.addf %31, %44 : vector<8x16xf32>
    %c0_19 = arith.constant 0 : index
    %c0_20 = arith.constant 0 : index
    %c2 = arith.constant 2 : index
    %46 = vector.load %arg1[%c0_19, %c0_20, %c2] : memref<1x8x18xbf16, #tpu.memory_space<vmem>>, vector<1x8x16xbf16>
    %47 = vector.shape_cast %46 : vector<1x8x16xbf16> to vector<8x16xbf16>
    %48 = arith.extf %47 : vector<8x16xbf16> to vector<8x16xf32>
    %49 = vector.broadcast %11 : vector<8x1xf32> to vector<8x16xf32>
    %50 = arith.mulf %48, %49 : vector<8x16xf32>
    %51 = vector.broadcast %12 : vector<8x1xf32> to vector<8x16xf32>
    %52 = arith.addf %50, %51 : vector<8x16xf32>
    %cst_21 = arith.constant 0.000000e+00 : f32
    %53 = vector.broadcast %cst_21 : f32 to vector<8x16xf32>
    %54 = arith.maximumf %52, %53 : vector<8x16xf32>
    %55 = arith.truncf %54 : vector<8x16xf32> to vector<8x16xbf16>
    %cst_22 = arith.constant 0.000000e+00 : bf16
    %56 = vector.shape_cast %10 : vector<1x16xi1> to vector<1x16xi1>
    %57 = vector.broadcast %56 : vector<1x16xi1> to vector<8x16xi1>
    %58 = vector.broadcast %cst_22 : bf16 to vector<8x16xbf16>
    %59 = arith.select %57, %55, %58 : vector<8x16xi1>, vector<8x16xbf16>
    %c2_23 = arith.constant 2 : index
    %c0_24 = arith.constant 0 : index
    %c0_25 = arith.constant 0 : index
    %60 = vector.load %arg5[%c2_23, %c0_24, %c0_25] : memref<3x8x8xbf16, #tpu.memory_space<vmem>>, vector<1x8x8xbf16>
    %61 = vector.shape_cast %60 : vector<1x8x8xbf16> to vector<8x8xbf16>
    %cst_26 = arith.constant dense<0.000000e+00> : vector<8x16xf32>
    %62 = tpu.matmul %61, %59, %cst_26 {dimension_numbers = #tpu.dot_dimension_numbers<[1], [0], [0], [1], [0, 0, 1, 1], [], []>} : vector<8x8xbf16>, vector<8x16xbf16>, vector<8x16xf32> -> vector<8x16xf32>
    %63 = arith.addf %45, %62 : vector<8x16xf32>
    %c0_27 = arith.constant 0 : index
    %c0_28 = arith.constant 0 : index
    %c1_29 = arith.constant 1 : index
    %64 = vector.load %arg2[%c0_27, %c0_28, %c1_29] : memref<1x4x18xbf16, #tpu.memory_space<vmem>>, vector<1x4x16xbf16>
    %65 = vector.shape_cast %64 : vector<1x4x16xbf16> to vector<4x16xbf16>
    %c0_30 = arith.constant 0 : index
    %c0_31 = arith.constant 0 : index
    %66 = vector.load %arg6[%c0_30, %c0_31] : memref<8x4xbf16, #tpu.memory_space<vmem>>, vector<8x4xbf16>
    %cst_32 = arith.constant dense<0.000000e+00> : vector<8x16xf32>
    %67 = tpu.matmul %66, %65, %cst_32 {dimension_numbers = #tpu.dot_dimension_numbers<[1], [0], [0], [1], [0, 0, 1, 1], [], []>} : vector<8x4xbf16>, vector<4x16xbf16>, vector<8x16xf32> -> vector<8x16xf32>
    %68 = arith.addf %63, %67 : vector<8x16xf32>
    %c0_33 = arith.constant 0 : index
    %c0_34 = arith.constant 0 : index
    %c0_35 = arith.constant 0 : index
    %69 = vector.load %arg7[%c0_33, %c0_34, %c0_35] : memref<1x8x16xf32, #tpu.memory_space<vmem>>, vector<1x8x16xf32>
    %70 = vector.shape_cast %69 : vector<1x8x16xf32> to vector<8x16xf32>
    %71 = vector.shape_cast %68 : vector<8x16xf32> to vector<1x8x16xf32>
    tpu.vector_store %arg7[%c0_33, %c0_34, %c0_35], %71 {strides = array<i32>} : memref<1x8x16xf32, #tpu.memory_space<vmem>>, vector<1x8x16xf32>,
    return
  }
  func.func @transform_0(%arg0: i32) -> (i32, i32, i32) {
    %c0_i32 = arith.constant 0 : i32
    %c0_i32_0 = arith.constant 0 : i32
    %c0_i32_1 = arith.constant 0 : i32
    return %arg0, %c0_i32, %c0_i32_0 : i32, i32, i32
  }
  func.func @transform_1(%arg0: i32) -> (i32, i32, i32) {
    %c0_i32 = arith.constant 0 : i32
    %c0_i32_0 = arith.constant 0 : i32
    %c0_i32_1 = arith.constant 0 : i32
    return %arg0, %c0_i32, %c0_i32_0 : i32, i32, i32
  }
  func.func @transform_2(%arg0: i32) -> (i32, i32) {
    %c0_i32 = arith.constant 0 : i32
    %c0_i32_0 = arith.constant 0 : i32
    %c0_i32_1 = arith.constant 0 : i32
    return %c0_i32, %c0_i32_0 : i32, i32
  }
  func.func @transform_3(%arg0: i32) -> (i32, i32) {
    %c0_i32 = arith.constant 0 : i32
    %c0_i32_0 = arith.constant 0 : i32
    %c0_i32_1 = arith.constant 0 : i32
    return %c0_i32, %c0_i32_0 : i32, i32
  }
  func.func @transform_4(%arg0: i32) -> (i32, i32, i32) {
    %c0_i32 = arith.constant 0 : i32
    %c0_i32_0 = arith.constant 0 : i32
    %c0_i32_1 = arith.constant 0 : i32
    %c0_i32_2 = arith.constant 0 : i32
    return %c0_i32, %c0_i32_0, %c0_i32_1 : i32, i32, i32
  }
  func.func @transform_5(%arg0: i32) -> (i32, i32) {
    %c0_i32 = arith.constant 0 : i32
    %c0_i32_0 = arith.constant 0 : i32
    %c0_i32_1 = arith.constant 0 : i32
    return %c0_i32, %c0_i32_0 : i32, i32
  }
  func.func @transform_6(%arg0: i32) -> (i32, i32, i32) {
    %c0_i32 = arith.constant 0 : i32
    %c0_i32_0 = arith.constant 0 : i32
    %c0_i32_1 = arith.constant 0 : i32
    return %arg0, %c0_i32, %c0_i32_0 : i32, i32, i32
  }
}

</mosaic_0001>

<bundles_post_ra>
// kernel: preact_resnet_block.2
= control target key start
LH: loop header
LB: loop body
LE: loop exit
PB: predicated region body
PF: predicated region fallthrough
CT: control target
= control target key end

     0   :  { %s605_s21 = smov 0   ;;  %s657_s0 = inlined_call_operand.vmem [shape: bf16[2,4,18], index: 0, kind: input, shape index: {}]   ;;  %s658_s1 = inlined_call_operand.vmem [shape: f32[4,1], index: 1, kind: input, shape index: {}]   ;;  %s659_s2 = inlined_call_operand.vmem [shape: f32[4,1], index: 2, kind: input, shape index: {}]   ;;  %s660_s3 = inlined_call_operand.vmem [shape: bf16[3,8,4], index: 3, kind: input, shape index: {}]   ;;  %s661_s4 = inlined_call_operand.vmem [shape: bf16[2,8,18], index: 4, kind: output, shape index: {0}]   ;;  %s662_s5 = inlined_call_operand.vmem [shape: f32[2,8,1], index: 5, kind: output, shape index: {1}]   ;;  %s663_s6 = inlined_call_operand.vmem [shape: f32[2,8,1], index: 6, kind: output, shape index: {2}]  }
   0x1 LB: > { %s527_s22 = sadd.s32 4294967295, %s563_s21   ;;  %p531_p0 = scmp.ge.s32.totalorder %s563_s21, 1  ;;  %s563_s21 = sphi %s605_s21, %s17_s21  }
   0x2   : > { %p216_p1 = scmp.lt.s32.totalorder %s563_s21, 3 }
   0x4   : > { %p217_p2 = pnand %p531_p0, %p216_p1 }
   0x5   : > { %s566_s27 = smov (!%p217_p2), 2   ;;  %p252_p3 = scmp.lt.s32.totalorder (!%p217_p2), %s527_s22, 1 }
   0x6   : > { %220 = sbr.rel (%p217_p2) target bundleno = 520 (0x208), region = 36  ;;  %s567_s8 = smov (!%p217_p2), 127  }
   0x7   : > { %s568_s9 = smov (!%p217_p2), 126   ;;  %s569_s16 = smov (!%p217_p2), 1  }
   0xb   : > { %v279_v0 = vld [vmem:[%s658_s1] sm:$0xf]  ;;  %v271_v1 = vlaneseq  ;;  %v565_v2 = vmov 0   ;;  %s665_s22 = smov (!%p252_p3, %s527_s22), 1  ;;  %vm311_vm9 = vcmask 1041408   ;;  %vm307_vm10 = vcmask 31744  }
   0xc   : > { %556 = vset.pattern.permute.xlu0 %v565_v2  ;;  %v280_v5 = vld [vmem:[%s659_s2] sm:$0xf]  ;;  %s532_s28 = sshll.u32 %s665_s22, 1  ;;  %v355_v9 = vunpack.c.l.b16 %v565_v2  ;;  %v356_v10 = vunpack.c.h.b16 %v565_v2  ;;  %v536_v27 = vld [vmem:[%s660_s3 + $0x4] sm:$0xf]  ;;  %vm399_vm11 = vcmask 130048  }
   0xd   : > { %285 = vperm.xlu0 %556, %v279_v0   ;;  %v272_v3 = vand.u32 127, %v271_v1  ;;  %s255_s7 = scalar_lea.vmem %s657_s0, %s532_s28  ;;  %v301_v24 = vld [vmem:[%s660_s3] sm:$0xf]  ;;  %v539_v30 = vld [vmem:[%s660_s3 + $0x8] sm:$0xf]  ;;  %s533_s17 = sshll.u32 %s665_s22, 2 }
   0xe   : > { %v281_v7 = vld [vmem:[%s255_s7] sm:$0x3]  ;;  %s259_s20 = scalar_lea.vmem %s661_s4, %s533_s17  ;;  %vm393_vm12 = vcmask 134152   ;;  %vm395_vm13 = vcmask 3072   ;;  %vm397_vm14 = vcmask 142472   ;;  %s534_s23 = sshll.u32 %s665_s22, 3 }
   0xf   : > { %vm277_vm0 = vcmp.lt.s32.totalorder %v272_v3, 15  ;;  %v282_v8 = vunpack.c.l.bf16 %v281_v7  ;;  %vm273_vm2 = vcmp.ge.s32.totalorder %v272_v3, 1  ;;  %vm274_vm3 = vcmp.lt.s32.totalorder %v272_v3, 17  ;;  %s263_s26 = scalar_lea.vmem %s662_s5, %s534_s23  ;;  %s267_s29 = scalar_lea.vmem %s663_s6, %s534_s23 }
  0x10   : > { %vm349_vm1 = vmpackc.low %vm277_vm0, %vm277_vm0  ;;  %vm409_vm15 = vcmask 7168  }
  0x11   : > { %v350_v4 = vsel %vm349_vm1, 65537, %v565_v2  ;;  %vm275_vm4 = vmand %vm273_vm2, %vm274_vm3 }
  0x12   : > { %351 = vrot.lane.b32.xlu1 %v350_v4, %s566_s27  ;;  %vm299_vm7 = vmpackc.low %vm275_vm4, %vm275_vm4 }
  0x15   : > { %291 = vperm.xlu0 %556, %v280_v5  }
  0x7f   : > { %v286_v6 = vpop.permute.xlu0 %285 }
  0x80   : > { %v288_v14 = vmul.f32 %v286_v6, %v282_v8 }
  0x84   : > { %v352_v11 = vpop.permute.xlu1 %351 }
  0x85   : > { %v353_v12 = vunpack.c.l.b16 %v352_v11  ;;  %v354_v13 = vunpack.c.h.b16 %v352_v11 }
  0x87   : > { %v292_v15 = vpop.permute.xlu0 %291  ;;  %vm357_vm5 = vcmp.ne.s32.totalorder %v353_v12, %v355_v9  ;;  %vm358_vm6 = vcmp.ne.s32.totalorder %v354_v13, %v356_v10 }
  0x88   : > { %v294_v16 = vadd.f32 %v292_v15, %v288_v14  ;;  %vm359_vm8 = vmpackc.low %vm358_vm6, %vm357_vm5 }
  0x8a   : > { %v295_v17 = vmax.f32 %v294_v16, 0.0 }
  0x8c   : > { %v296_v18 = vpack.c.bf16 %v295_v17, %v295_v17 }
  0x8e   : > { %305 = vrot.lane.b32.xlu2 %v296_v18, %s567_s8  ;;  %v300_v19 = vsel %vm299_vm7, %v296_v18, 0  ;;  %v360_v20 = vsel %vm359_vm8, %v296_v18, 0 }
  0x8f   : > { %v332_v21 = vsel %vm311_vm9, %v300_v19, 0  ;;  %v364_v22 = vunpack.c.l.b16 %v360_v20 }
  0x90   : > { %341 = vmatpush.bf16.msra.mxu1 %v332_v21 }
  0x91   : > { %v365_v23 = vpack.c.b16 %v364_v22, %v364_v22 }
  0x93   : > { %366 = vrot.lane.b32.xlu1 %v365_v23, %s568_s9  ;;  %538 = vmatmul.msk.bf16.vlgmr.msra.gmra.mxu1 %vm307_vm10, %v301_v24 }
  0xe8   : > { %v306_v25 = vpop.permute.xlu2 %305 }
  0xe9   : > { %v313_v26 = vsel %vm311_vm9, %v306_v25, 0 }
  0xea   : > { %322 = vmatpush.bf16.msra.mxu0 %v313_v26 }
  0xed   : > { %537 = vmatmul.msk.bf16.vlgmr.msra.gmra.mxu0 %vm307_vm10, %v536_v27 }
 0x105   : > { %v367_v28 = vpop.permute.xlu1 %366 }
 0x106   : > { %v372_v29 = vsel %vm311_vm9, %v367_v28, 0 }
 0x107   : > { %381 = vmatpush.bf16.msra.mxu2 %v372_v29 }
 0x10a   : > { %540 = vmatmul.msk.bf16.vlgmr.msra.gmra.mxu2 %vm307_vm10, %v539_v30 }
 0x110   : > { %v343_v31 = vpop.f32.mrf.mxu1 }
 0x118   : > { %v345_v33 = vpop.f32.mrf.mxu1 }
 0x16a   : > { %v324_v32 = vpop.f32.mrf.mxu0 }
 0x16b   : > { %v344_v35 = vadd.f32 %v343_v31, %v324_v32 }
 0x172   : > { %v326_v34 = vpop.f32.mrf.mxu0 }
 0x18d   : > { %v383_v36 = vpop.f32.mrf.mxu2 }
 0x18e   : > { %v387_v37 = vadd.f32 %v383_v36, %v344_v35 }
 0x190   : > { %v400_v38 = vsel %vm399_vm11, %v387_v37, 0.0  ;;  %v388_v39 = vpack.c.bf16 %v387_v37, %v387_v37  ;;  %v404_v40 = vmul.f32 %v387_v37, %v387_v37 }
 0x191   : > { %401 = vadd.xlane.f32.xlu0 %v400_v38 }
 0x192   : > { %390 = vrot.lane.b32.xlu2 %v388_v39, %s569_s16  ;;  %v405_v41 = vsel %vm399_vm11, %v404_v40, 0.0 }
 0x193   : > { %406 = vadd.xlane.f32.xlu1 %v405_v41 }
 0x195   : > { %v385_v42 = vpop.f32.mrf.mxu2 }
 0x1ec   : > { %v391_v43 = vpop.permute.xlu2 %390 }
 0x1ed   : > { %394 = vst.msk [vmem:[%s259_s20] sm:$0xf] %vm393_vm12, %v391_v43 }
 0x1ee   : > { %396 = vst.msk [vmem:[%s259_s20] sm:$0xf] %vm395_vm13, %v565_v2 }
 0x1ef   : > { %398 = vst.msk [vmem:[%s259_s20] sm:$0xf] %vm397_vm14, %v565_v2 }
 0x204   : > { %v402_v44 = vpop.xlane.xlu0 %401 }
 0x205   : > { %410 = vst.msk [vmem:[%s263_s26] sm:$0xff] %vm409_vm15, %v402_v44 }
 0x206   : > { %v407_v45 = vpop.xlane.xlu1 %406 }
 0x207   : > { %411 = vst.msk [vmem:[%s267_s29] sm:$0xff] %vm409_vm15, %v407_v45 }
 0x208 PF: > { %s17_s21 = sadd.s32 1, %s563_s21  }
 0x209   : > { %p14_p4 = scmp.ge.s32.totalorder %s17_s21, 4  }
 0x20b   :  { %16 = sbr.rel (!%p14_p4) target bundleno = 1 (0x1), region = 92 }

// kernel: preact_resnet_block.3
= control target key start
LH: loop header
LB: loop body
LE: loop exit
PB: predicated region body
PF: predicated region fallthrough
CT: control target
= control target key end

     0   :  { %11 = vsyncpa [#allocation3], 0  ;;  %s776_s0 = inlined_call_operand.vmem [shape: bf16[2,8,18], index: 0, kind: input, shape index: {}]   ;;  %s777_s1 = inlined_call_operand.vmem [shape: bf16[2,4,18], index: 1, kind: input, shape index: {}]   ;;  %s778_s2 = inlined_call_operand.vmem [shape: f32[8,1], index: 2, kind: input, shape index: {}]   ;;  %s779_s3 = inlined_call_operand.vmem [shape: f32[8,1], index: 3, kind: input, shape index: {}]   ;;  %s780_s4 = inlined_call_operand.vmem [shape: bf16[3,8,8], index: 4, kind: input, shape index: {}]   ;;  %s781_s5 = inlined_call_operand.vmem [shape: bf16[8,4], index: 5, kind: input, shape index: {}]   ;;  %s782_s6 = inlined_call_operand.hbm [shape: f32[2,8,16], index: 6, kind: output, shape index: {}]  }
   0x1   :  { %13 = vsyncpa [#allocation3 + $0x1], 0  ;;  %s667_s21 = smov 0   ;;  %s669_s22 = smov 0  }
   0x2   :  { %s671_s23 = smov 0   ;;  %s673_s24 = smov 0  }
   0x3 LB: > { %s688_s25 = sadd.s32 4294967295, %s626_s24   ;;  %s503_s26 = sadd.s32 4294967294, %s626_s24   ;;  %s626_s24 = sphi %s673_s24, %s788_s24   ;;  %s622_s23 = sphi %s671_s23, %s787_s23   ;;  %s618_s22 = sphi %s669_s22, %s786_s22   ;;  %s614_s21 = sphi %s667_s21, %s785_s21  }
   0x4   : > { %s692_s27 = sadd.s32 1, %s626_s24   ;;  %s162_s28 = sadd.s32 1, %s622_s23 }
   0x5   : > { %s159_s29 = ssub.s32 %s626_s24, %s692_s27  ;;  %p172_p0 = scmp.ne.s32.totalorder %s622_s23, %s618_s22 }
   0x6   : > { %p160_p1 = scmp.eq.s32.totalorder %s159_s29, 0  ;;  %p173_p2 = scmp.eq.s32.totalorder %s688_s25, 1 }
   0x7   : > { %p178_p3 = scmp.ne.s32.totalorder %s618_s22, %s614_s21  ;;  %p179_p4 = scmp.eq.s32.totalorder %s503_s26, 1 }
   0x8   : > { %s703_s30 = scalar_select %p160_p1, %s622_s23, %s162_s28  }
   0x9   : > { %p705_p5 = por %p173_p2, %p172_p0  ;;  %p709_p6 = por %p179_p4, %p178_p3 }
   0xa   : > { %p506_p7 = scmp.ge.s32.totalorder %s626_s24, 1  ;;  %p223_p8 = scmp.lt.s32.totalorder %s626_s24, 3 }
   0xc   : > { %p224_p9 = pnand %p506_p7, %p223_p8 }
   0xd   : > { %s629_s13 = smov (!%p224_p9), 2   ;;  %p256_p10 = scmp.lt.s32.totalorder (!%p224_p9), %s688_s25, 1 }
   0xe   : > { %227 = sbr.rel (%p224_p9) target bundleno = 414 (0x19e), region = 44  ;;  %s630_s19 = smov (!%p224_p9), 127  }
   0xf   : > { %s631_s9 = smov (!%p224_p9), 126   ;;  %s584_s16 = scalar_lea.hbm (!%p224_p9), %s782_s6, 16 }
  0x13   : > { %v275_v0 = vld [vmem:[%s778_s2] sm:$0xff]  ;;  %v267_v1 = vlaneseq  ;;  %v628_v2 = vmov 0   ;;  %s257_s14 = scalar_select %p256_p10, %s688_s25, 1  ;;  %vm307_vm9 = vcmask 1043456   ;;  %vm396_vm10 = vcmask 1041408  }
  0x14   : > { %563 = vset.pattern.permute.xlu0 %v628_v2  ;;  %v276_v5 = vld [vmem:[%s779_s3] sm:$0xff]  ;;  %v351_v11 = vunpack.c.l.b16 %v628_v2  ;;  %v352_v12 = vunpack.c.h.b16 %v628_v2  ;;  %vm392_vm11 = vcmask 31744   ;;  %vm303_vm12 = vcmask 64512   ;;  %v513_v35 = vld [vmem:[%s780_s4 + $0x8] sm:$0xf] }
  0x15   : > { %281 = vperm.xlu0 %563, %v275_v0   ;;  %v268_v3 = vand.u32 127, %v267_v1  ;;  %s509_s15 = sshll.u32 %s257_s14, 1  ;;  %s508_s20 = sshll.u32 %s257_s14, 2  ;;  %v385_v28 = vld [vmem:[%s781_s5] sm:$0xf]  ;;  %vm414_vm13 = vcmask 130048  }
  0x16   : > { %s263_s18 = scalar_lea.vmem %s777_s1, %s509_s15  ;;  %s259_s29 = scalar_lea.vmem %s776_s0, %s508_s20  ;;  %v297_v29 = vld [vmem:[%s780_s4] sm:$0xf]  ;;  %v510_v32 = vld [vmem:[%s780_s4 + $0x4] sm:$0xf] }
  0x17   : > { %vm273_vm0 = vcmp.lt.s32.totalorder %v268_v3, 15  ;;  %v384_v6 = vld [vmem:[%s263_s18] sm:$0x3]  ;;  %vm269_vm2 = vcmp.ge.s32.totalorder %v268_v3, 1  ;;  %vm270_vm3 = vcmp.lt.s32.totalorder %v268_v3, 17  ;;  %s253_s18 = sand.u32 1, %s618_s22  }
  0x18   : > { %vm345_vm1 = vmpackc.low %vm273_vm0, %vm273_vm0  ;;  %387 = vst [vmem:[#allocation1] ss:$4 sm:$0xff] %v384_v6  ;;  %v277_v9 = vld [vmem:[%s259_s29] sm:$0xf]  ;;  %s517_s20 = sshll.u32 %s688_s25, 3  ;;  %s417_s12 = scalar_lea.sflag [#allocation3], %s253_s18 }
  0x19   : > { %v346_v4 = vsel %vm345_vm1, 65537, %v628_v2  ;;  %v278_v10 = vunpack.c.l.bf16 %v277_v9  ;;  %vm271_vm4 = vmand %vm269_vm2, %vm270_vm3  ;;  %s427_s29 = scalar_lea.hbm %s782_s6, %s517_s20 }
  0x1a   : > { %347 = vrot.lane.b32.xlu1 %v346_v4, %s629_s13  ;;  %vm295_vm7 = vmpackc.low %vm271_vm4, %vm271_vm4  ;;  %s431_s11 = sshll.u32 %s427_s29, 4  ;;  %s432_s11 = int_to_ptr.hbm [resolvable:$true] %s431_s11 }
  0x1b   : > { %s578_s13 = sshra.s32 %s432_s11, 4  ;;  %s579_s13 = int_to_ptr.hbm [resolvable:$true] %s578_s13 }
  0x1c   : > { %s580_s25 = scalar_lea.hbm %s579_s13, 8  ;;  %p585_p0 = scmp.lt.s32.totalorder %s579_s13, %s782_s6 }
  0x1d   : > { %287 = vperm.xlu0 %563, %v276_v5   ;;  %p581_p11 = scmp.ne.s32.totalorder %s579_s13, %s580_s25  ;;  %p586_p1 = scmp.lt.s32.totalorder %s584_s16, %s580_s25 }
  0x1f   : > { %v388_v7 = vld.sshfl [vmem:[#allocation1] sm:$0xff pattern:$0x73625140]  ;;  %p582_p12 = pnand %p581_p11, %p705_p5  ;;  %p587_p2 = por %p586_p1, %p585_p0 }
  0x20   : > { %390 = vrot.lane.b32.xlu2 %v388_v7, %s630_s19 }
  0x21   : > { %p583_p13 = pneg %p582_p12 }
  0x23   : > { %p588_p3 = pnand %p587_p2, %p583_p13 }
  0x7a   : > { %v391_v26 = vpop.permute.xlu2 %390 }
  0x7b   : > { %v398_v27 = vsel %vm396_vm10, %v391_v26, 0 }
  0x7c   : > { %407 = vmatpush.bf16.msra.mxu3 %v398_v27 }
  0x7f   : > { %515 = vmatmul.msk.bf16.vlgmr.msra.gmra.mxu3 %vm392_vm11, %v385_v28 }
  0x87   : > { %v282_v8 = vpop.permute.xlu0 %281 }
  0x88   : > { %v284_v16 = vmul.f32 %v282_v8, %v278_v10 }
  0x8c   : > { %v348_v13 = vpop.permute.xlu1 %347 }
  0x8d   : > { %v349_v14 = vunpack.c.l.b16 %v348_v13  ;;  %v350_v15 = vunpack.c.h.b16 %v348_v13 }
  0x8f   : > { %v288_v17 = vpop.permute.xlu0 %287  ;;  %vm353_vm5 = vcmp.ne.s32.totalorder %v349_v14, %v351_v11  ;;  %vm354_vm6 = vcmp.ne.s32.totalorder %v350_v15, %v352_v12 }
  0x90   : > { %v290_v18 = vadd.f32 %v288_v17, %v284_v16  ;;  %vm355_vm8 = vmpackc.low %vm354_vm6, %vm353_vm5 }
  0x92   : > { %v291_v19 = vmax.f32 %v290_v18, 0.0 }
  0x94   : > { %v292_v20 = vpack.c.bf16 %v291_v19, %v291_v19 }
  0x96   : > { %301 = vrot.lane.b32.xlu2 %v292_v20, %s630_s19  ;;  %v296_v21 = vsel %vm295_vm7, %v292_v20, 0  ;;  %v356_v22 = vsel %vm355_vm8, %v292_v20, 0  ;;  %s507_s19 = sshll.u32 %s253_s18, 3 }
  0x97   : > { %v328_v23 = vsel %vm307_vm9, %v296_v21, 0  ;;  %v360_v24 = vunpack.c.l.b16 %v356_v22 }
  0x98   : > { %337 = vmatpush.bf16.msra.mxu1 %v328_v23 }
  0x99   : > { %v361_v25 = vpack.c.b16 %v360_v24, %v360_v24 }
  0x9b   : > { %362 = vrot.lane.b32.xlu1 %v361_v25, %s631_s9  ;;  %512 = vmatmul.msk.bf16.vlgmr.msra.gmra.mxu1 %vm303_vm12, %v297_v29  ;;  %s255_s9 = scalar_lea.vmem [#allocation2], %s507_s19 }
  0x9c   : > { %s429_s10 = sshll.u32 %s255_s9, 4  ;;  %s430_s10 = int_to_ptr.vmem [resolvable:$true] %s429_s10 }
  0xf0   : > { %v302_v30 = vpop.permute.xlu2 %301 }
  0xf1   : > { %v309_v31 = vsel %vm307_vm9, %v302_v30, 0 }
  0xf2   : > { %318 = vmatpush.bf16.msra.mxu0 %v309_v31 }
  0xf5   : > { %511 = vmatmul.msk.bf16.vlgmr.msra.gmra.mxu0 %vm303_vm12, %v510_v32 }
 0x102   : > { %v409_v36 = vpop.f32.mrf.mxu3 }
 0x10a   : > { %v411_v37 = vpop.f32.mrf.mxu3 }
 0x10d   : > { %v363_v33 = vpop.permute.xlu1 %362 }
 0x10e   : > { %v368_v34 = vsel %vm307_vm9, %v363_v33, 0 }
 0x10f   : > { %377 = vmatpush.bf16.msra.mxu2 %v368_v34 }
 0x112   : > { %514 = vmatmul.msk.bf16.vlgmr.msra.gmra.mxu2 %vm303_vm12, %v513_v35 }
 0x118   : > { %v339_v38 = vpop.f32.mrf.mxu1 }
 0x120   : > { %v341_v40 = vpop.f32.mrf.mxu1 }
 0x172   : > { %v320_v39 = vpop.f32.mrf.mxu0 }
 0x173   : > { %v340_v42 = vadd.f32 %v339_v38, %v320_v39 }
 0x17a   : > { %v322_v41 = vpop.f32.mrf.mxu0 }
 0x195   : > { %v379_v43 = vpop.f32.mrf.mxu2 }
 0x196   : > { %v383_v44 = vadd.f32 %v379_v43, %v340_v42 }
 0x198   : > { %v413_v45 = vadd.f32 %v409_v36, %v383_v44 }
 0x19a   : > { %415 = vst.msk [vmem:[%s255_s9] sm:$0xff] %vm414_vm13, %v413_v45 }
 0x19b   : > { %591 = shalt.err (!%p588_p3)
}
 0x19c   : > { %520 = dma.vmem_to_hbm [thread:$0]  (%p705_p5), %s430_s10, 128, %s432_s11, %s417_s12  }
 0x19d   : > { %v381_v46 = vpop.f32.mrf.mxu2 }
 0x19e PF: > { %p526_p4 = scmp.ge.s32.totalorder %s626_s24, 2  ;;  %s443_s18 = sand.u32 1, %s614_s21  }
 0x19f   : > { %s444_s20 = scalar_lea.sflag [#allocation3], %s443_s18 }
 0x1a0   : > { %p523_p7 = pnand %p526_p4, %p709_p6 }
 0x1a2   : > { %p524_p8 = pneg %p523_p7 }
 0x1a4   : > { %609 = dma.done.wait (%p524_p8), %s444_s20, 128  }
 0x1a5   : > { %611 = vsyncadd (%p524_p8), %s444_s20, 4294967168  ;;  %p16_p9 = scmp.ge.s32.totalorder %s692_s27, 4   ;;  %s785_s21 = smov %s618_s22 }
 0x1a6   : > { %s786_s22 = smov %s622_s23  ;;  %s787_s23 = smov %s703_s30 }
 0x1a7   : > { %s788_s24 = smov %s692_s27  ;;  %18 = sbr.rel (!%p16_p9) target bundleno = 3 (0x3), region = 84 }
 0x1ac   :  { %450 = vsyncpa [#allocation3], 1 }
 0x1ad   :  { %452 = vsyncpa [#allocation3 + $0x1], 1 }

</bundles_post_ra>
